<compile_context>
chip_gen: v7x
topology: tpu7x:2x2x1
jax: 0.10.0
libtpu: 0.0.40
codegen_flags: <defaults>
</compile_context>

<pallas_src>
import math
import jax
import jax.numpy as jnp
from jax.experimental import pallas as pl
from jax.experimental.pallas import tpu as pltpu


def _round_up(x, m):
    return ((x + m - 1) // m) * m


def _linear_softmax_kernel(x_ref, w_ref, b_ref, logits_ref, probs_ref):
    # x_ref:      (TM, TK)       f32 or bf16
    # w_ref:      (TK, n_class)  bf16
    # b_ref:      (1,  n_class)  f32
    # logits_ref: (TM, n_class)  f32  (VMEM-resident across k; doubles as accumulator)
    # probs_ref:  (TM, n_class)  f32
    k = pl.program_id(1)

    @pl.when(k == 0)
    def _():
        # Initialize the accumulator with the bias (saves a separate scratch
        # buffer, a full-tile copy and a full-tile add in the epilogue).
        logits_ref[...] = jnp.broadcast_to(b_ref[...], logits_ref.shape)

    logits_ref[...] += jnp.dot(
        x_ref[...].astype(jnp.bfloat16),
        w_ref[...],
        preferred_element_type=jnp.float32,
    )

    @pl.when(k == pl.num_programs(1) - 1)
    def _():
        logits = logits_ref[...]
        m = jnp.max(logits, axis=-1, keepdims=True)
        e = jnp.exp(logits - m)
        denom = jnp.sum(e, axis=-1, keepdims=True)
        # Exact reciprocal (still EUP, cheap) so softmax rows sum to 1.
        probs_ref[...] = e * pl.reciprocal(denom, approx=False)


def prepare_params(w_t, b):
    """One-time weight prep (keep pad + bf16 cast OFF the per-call critical path).

    w_t: (feature_length, n_class) f32  (transpose of PyTorch fc.weight)
    b:   (n_class,)                f32
    Returns:
      w_p: (F_pad, n_class) bf16, F padded to a multiple of 128
      b_p: (1, n_class)     f32
    """
    F_len, n_class = w_t.shape
    F_pad = _round_up(F_len, 128)
    w_bf16 = w_t.astype(jnp.bfloat16)
    if F_pad == F_len:
        w_p = w_bf16
    else:
        w_p = jnp.zeros((F_pad, n_class), jnp.bfloat16).at[:F_len, :].set(w_bf16)
    b_p = b.astype(jnp.float32).reshape(1, n_class)
    return w_p, b_p


def _choose_tk(F_pad, tk_max):
    """Largest multiple of 128 that divides F_pad and is <= tk_max."""
    n128 = F_pad // 128
    cap = max(128, (min(tk_max, F_pad) // 128) * 128)
    best = 128
    d = 1
    while d * d <= n128:
        if n128 % d == 0:
            for cand in (d, n128 // d):
                tk_c = cand * 128
                if tk_c <= cap and tk_c > best:
                    best = tk_c
        d += 1
    return best


def linear_model_forward(x_nchw, w_p, b_p, *, tm=512, tk=4096):
    """Pallas equivalent of LinearModel.forward.

    x_nchw: (B, C, H, W) float32
    w_p, b_p: outputs of prepare_params()
    Returns (logits, softmax_probs), both (B, n_class) float32.
    """
    B = x_nchw.shape[0]
    feature = x_nchw.reshape(B, -1)  # matches torch x.reshape(x.shape[0], -1); free
    F_len = feature.shape[1]
    F_pad, n_class = w_p.shape
    assert F_pad >= F_len and F_pad == _round_up(F_len, 128)

    # --- batch (M) tiling: sublane aligned, >=2 m-tiles when possible (v7x
    # megacore), and padding waste kept near round_up(B, 8).
    B8 = _round_up(B, 8)
    TM = min(tm, B8)
    if B8 >= 16:
        TM = min(TM, _round_up((B8 + 1) // 2, 8))
    B_pad = _round_up(B8, TM)
    m_tiles = B_pad // TM

    # --- feature (K) tiling: divides F_pad exactly, bounded by tk.
    TK = _choose_tk(F_pad, tk)
    k_tiles = F_pad // TK

    # --- x operand: prefer passing f32 directly (cast per-tile in-kernel).
    # Only if padding is unavoidable do we materialize a padded copy, and then
    # the bf16 cast is fused into that single pass.
    if B_pad == B and F_pad == F_len:
        x_in = feature
    else:
        x_in = (
            jnp.zeros((B_pad, F_pad), jnp.bfloat16)
            .at[:B, :F_len]
            .set(feature.astype(jnp.bfloat16))
        )

    out_shapes = (
        jax.ShapeDtypeStruct((B_pad, n_class), jnp.float32),
        jax.ShapeDtypeStruct((B_pad, n_class), jnp.float32),
    )

    fn = pl.pallas_call(
        _linear_softmax_kernel,
        out_shape=out_shapes,
        grid=(m_tiles, k_tiles),                              # K (reduction) last
        in_specs=[
            pl.BlockSpec((TM, TK), lambda i, k: (i, k)),       # x tile
            pl.BlockSpec((TK, n_class), lambda i, k: (k, 0)),  # weight tile (unpadded N)
            pl.BlockSpec((1, n_class), lambda i, k: (0, 0)),   # bias (resident)
        ],
        out_specs=[
            pl.BlockSpec((TM, n_class), lambda i, k: (i, 0)),  # logits (= accumulator)
            pl.BlockSpec((TM, n_class), lambda i, k: (i, 0)),  # probs
        ],
        compiler_params=pltpu.CompilerParams(
            dimension_semantics=("parallel", "arbitrary"),
            # ~20 MiB footprint at TM=512/TK=4096; keep headroom under v7x's
            # 64 MiB physical VMEM while exceeding v5e's 16 MiB scoped default.
            vmem_limit_bytes=40 * 1024 * 1024,
        ),
    )
    logits_p, probs_p = fn(x_in, w_p, b_p)
    return logits_p[:B], probs_p[:B]


def init_linear_params(key, feature_length, n_class):
    """Deterministic init mirroring nn.Linear defaults (kaiming-uniform-ish)."""
    k_w, k_b = jax.random.split(key)
    bound = 1.0 / math.sqrt(feature_length)
    # PyTorch fc.weight has shape (n_class, feature_length); we store transpose.
    w_t = jax.random.uniform(
        k_w, (feature_length, n_class), jnp.float32, minval=-bound, maxval=bound
    )
    b = jax.random.uniform(
        k_b, (n_class,), jnp.float32, minval=-bound, maxval=bound
    )
    return w_t, b


if __name__ == "__main__":
    key = jax.random.PRNGKey(0)
    k_x, k_p = jax.random.split(key)

    # Module config: shape = (C, H, W), n_class
    B, C, H, W = 2, 4, 16, 16
    n_class = 10
    feature_length = C * H * W  # shape[0]*shape[1]*shape[2]

    x = jax.random.normal(k_x, (B, C, H, W), jnp.float32)
    w_t, b = init_linear_params(k_p, feature_length, n_class)
    w_p, b_p = prepare_params(w_t, b)  # once, off the per-call critical path

    logits, probs = linear_model_forward(x, w_p, b_p)
    jax.block_until_ready((logits, probs))

    # Sanity check against plain-JAX f32 reference (tolerances account for the
    # bf16 operands on the MXU).
    ref_logits = x.reshape(B, -1) @ w_t + b
    ref_probs = jax.nn.softmax(ref_logits, axis=1)
    assert logits.shape == (B, n_class) and probs.shape == (B, n_class)
    assert jnp.allclose(logits, ref_logits, atol=5e-2, rtol=5e-2), (
        jnp.max(jnp.abs(logits - ref_logits))
    )
    assert jnp.allclose(probs, ref_probs, atol=1e-2, rtol=1e-2), (
        jnp.max(jnp.abs(probs - ref_probs))
    )
    assert jnp.allclose(jnp.sum(probs, axis=1), 1.0, atol=1e-3)

    print("KERNEL_OK")
</pallas_src>

<mosaic_0001>
module attributes {stable_mosaic.version = 11 : i64} {
  func.func @_linear_softmax_kernel(%arg0: i32, %arg1: i32, %arg2: memref<8x1024xbf16, #tpu.memory_space<vmem>>, %arg3: memref<1024x10xbf16, #tpu.memory_space<vmem>>, %arg4: memref<1x10xf32, #tpu.memory_space<vmem>>, %arg5: memref<8x10xf32, #tpu.memory_space<vmem>>, %arg6: memref<8x10xf32, #tpu.memory_space<vmem>>) attributes {dimension_semantics = [#tpu.dimension_semantics<parallel>, #tpu.dimension_semantics<arbitrary>], iteration_bounds = array<i64: 1, 1>, scalar_prefetch = 0 : i64, scratch_operands = 0 : i64, tpu.core_type = #tpu.core_type<tc>, window_params = [{transform_indices = @transform_0, window_bounds = array<i64: 8, 1024>}, {transform_indices = @transform_1, window_bounds = array<i64: 1024, 10>}, {pipeline_mode = #tpu.pipeline_mode<synchronous>, transform_indices = @transform_2, window_bounds = array<i64: 1, 10>}, {transform_indices = @transform_3, window_bounds = array<i64: 8, 10>}, {transform_indices = @transform_4, window_bounds = array<i64: 8, 10>}]} {
    %c0_i32 = arith.constant 0 : i32
    %0 = arith.cmpi eq, %arg1, %c0_i32 : i32
    %1 = arith.extui %0 : i1 to i32
    %c0_i32_0 = arith.constant 0 : i32
    %2 = arith.cmpi ne, %1, %c0_i32_0 : i32
    scf.if %2 {
      %c0_10 = arith.constant 0 : index
      %c0_11 = arith.constant 0 : index
      %12 = vector.load %arg4[%c0_10, %c0_11] : memref<1x10xf32, #tpu.memory_space<vmem>>, vector<1x10xf32>
      %13 = vector.shape_cast %12 : vector<1x10xf32> to vector<1x10xf32>
      %14 = vector.broadcast %13 : vector<1x10xf32> to vector<8x10xf32>
      %c0_12 = arith.constant 0 : index
      %c0_13 = arith.constant 0 : index
      %15 = vector.load %arg5[%c0_12, %c0_13] : memref<8x10xf32, #tpu.memory_space<vmem>>, vector<8x10xf32>
      tpu.vector_store %arg5[%c0_12, %c0_13], %14 {strides = array<i32>} : memref<8x10xf32, #tpu.memory_space<vmem>>, vector<8x10xf32>,
    } else {
    }
    %c0 = arith.constant 0 : index
    %c0_1 = arith.constant 0 : index
    %3 = vector.load %arg5[%c0, %c0_1] : memref<8x10xf32, #tpu.memory_space<vmem>>, vector<8x10xf32>
    %c0_2 = arith.constant 0 : index
    %c0_3 = arith.constant 0 : index
    %4 = vector.load %arg2[%c0_2, %c0_3] : memref<8x1024xbf16, #tpu.memory_space<vmem>>, vector<8x1024xbf16>
    %c0_4 = arith.constant 0 : index
    %c0_5 = arith.constant 0 : index
    %5 = vector.load %arg3[%c0_4, %c0_5] : memref<1024x10xbf16, #tpu.memory_space<vmem>>, vector<1024x10xbf16>
    %cst = arith.constant dense<0.000000e+00> : vector<8x10xf32>
    %6 = tpu.matmul %4, %5, %cst {dimension_numbers = #tpu.dot_dimension_numbers<[1], [0], [0], [1], [0, 0, 1, 1], [], []>} : vector<8x1024xbf16>, vector<1024x10xbf16>, vector<8x10xf32> -> vector<8x10xf32>
    %7 = arith.addf %3, %6 : vector<8x10xf32>
    %c0_6 = arith.constant 0 : index
    %c0_7 = arith.constant 0 : index
    %8 = vector.load %arg5[%c0_6, %c0_7] : memref<8x10xf32, #tpu.memory_space<vmem>>, vector<8x10xf32>
    tpu.vector_store %arg5[%c0_6, %c0_7], %7 {strides = array<i32>} : memref<8x10xf32, #tpu.memory_space<vmem>>, vector<8x10xf32>,
    %c0_i32_8 = arith.constant 0 : i32
    %9 = arith.cmpi eq, %arg1, %c0_i32_8 : i32
    %10 = arith.extui %9 : i1 to i32
    %c0_i32_9 = arith.constant 0 : i32
    %11 = arith.cmpi ne, %10, %c0_i32_9 : i32
    scf.if %11 {
      %c0_10 = arith.constant 0 : index
      %c0_11 = arith.constant 0 : index
      %12 = vector.load %arg5[%c0_10, %c0_11] : memref<8x10xf32, #tpu.memory_space<vmem>>, vector<8x10xf32>
      %cst_12 = arith.constant dense<0xFF800000> : vector<8xf32>
      %13 = vector.multi_reduction <maximumf>, %12, %cst_12 [1] : vector<8x10xf32> to vector<8xf32>
      %14 = vector.shape_cast %13 : vector<8xf32> to vector<8x1xf32>
      %15 = vector.broadcast %14 : vector<8x1xf32> to vector<8x10xf32>
      %16 = arith.subf %12, %15 : vector<8x10xf32>
      %17 = math.exp %16 : vector<8x10xf32>
      %cst_13 = arith.constant dense<0.000000e+00> : vector<8xf32>
      %18 = vector.multi_reduction <add>, %17, %cst_13 [1] : vector<8x10xf32> to vector<8xf32>
      %19 = vector.shape_cast %18 : vector<8xf32> to vector<8x1xf32>
      %20 = tpu.reciprocal %19 : vector<8x1xf32> -> vector<8x1xf32>
      %21 = vector.broadcast %20 : vector<8x1xf32> to vector<8x10xf32>
      %22 = arith.mulf %17, %21 : vector<8x10xf32>
      %c0_14 = arith.constant 0 : index
      %c0_15 = arith.constant 0 : index
      %23 = vector.load %arg6[%c0_14, %c0_15] : memref<8x10xf32, #tpu.memory_space<vmem>>, vector<8x10xf32>
      tpu.vector_store %arg6[%c0_14, %c0_15], %22 {strides = array<i32>} : memref<8x10xf32, #tpu.memory_space<vmem>>, vector<8x10xf32>,
    } else {
    }
    return
  }
  func.func @transform_0(%arg0: i32, %arg1: i32) -> (i32, i32) {
    %c0_i32 = arith.constant 0 : i32
    return %arg0, %arg1 : i32, i32
  }
  func.func @transform_1(%arg0: i32, %arg1: i32) -> (i32, i32) {
    %c0_i32 = arith.constant 0 : i32
    %c0_i32_0 = arith.constant 0 : i32
    return %arg1, %c0_i32 : i32, i32
  }
  func.func @transform_2(%arg0: i32, %arg1: i32) -> (i32, i32) {
    %c0_i32 = arith.constant 0 : i32
    %c0_i32_0 = arith.constant 0 : i32
    %c0_i32_1 = arith.constant 0 : i32
    return %c0_i32, %c0_i32_0 : i32, i32
  }
  func.func @transform_3(%arg0: i32, %arg1: i32) -> (i32, i32) {
    %c0_i32 = arith.constant 0 : i32
    %c0_i32_0 = arith.constant 0 : i32
    return %arg0, %c0_i32 : i32, i32
  }
  func.func @transform_4(%arg0: i32, %arg1: i32) -> (i32, i32) {
    %c0_i32 = arith.constant 0 : i32
    %c0_i32_0 = arith.constant 0 : i32
    return %arg0, %c0_i32 : i32, i32
  }
}

</mosaic_0001>

<bundles_post_ra>
// kernel: tpu_custom_call.1
= control target key start
LH: loop header
LB: loop body
LE: loop exit
PB: predicated region body
PF: predicated region fallthrough
CT: control target
= control target key end

     0   :  { %10 = vsyncpa [#allocation3], 0  ;;  %s1334_s0 = inlined_call_operand.vmem [shape: bf16[8,1024], index: 0, kind: input, shape index: {}]   ;;  %s1335_s1 = inlined_call_operand.vmem [shape: bf16[1024,10], index: 1, kind: input, shape index: {}]   ;;  %s1336_s2 = inlined_call_operand.vmem [shape: f32[1,10], index: 2, kind: input, shape index: {}]   ;;  %s1337_s3 = inlined_call_operand.hbm [shape: f32[8,10], index: 3, kind: output, shape index: {0}]   ;;  %s1338_s4 = inlined_call_operand.hbm [shape: f32[8,10], index: 4, kind: output, shape index: {1}]  }
   0x1   :  { %v947_v0 = vld [vmem:[%s1335_s1 + $0x40] sm:$0xff]   ;;  %v951_v4 = vld [vmem:[%s1335_s1 + $0x48] sm:$0xff]   ;;  %v955_v8 = vld [vmem:[%s1335_s1 + $0x50] sm:$0xff]  }
   0x2   :  { %v948_v1 = vld [vmem:[%s1335_s1 + $0xc0] sm:$0xff]   ;;  %857 = vmatprep.subr.bf16.mxu0 %v947_v0  ;;  %v952_v5 = vld [vmem:[%s1335_s1 + $0xc8] sm:$0xff]   ;;  %v956_v9 = vld [vmem:[%s1335_s1 + $0xd0] sm:$0xff]  }
   0x3   :  { %v949_v2 = vld [vmem:[%s1335_s1] sm:$0xff]   ;;  %879 = vmatprep.subr.bf16.mxu1 %v948_v1  ;;  %v953_v6 = vld [vmem:[%s1335_s1 + $0x8] sm:$0xff]   ;;  %v957_v10 = vld [vmem:[%s1335_s1 + $0x10] sm:$0xff]  }
   0x4   :  { %v950_v3 = vld [vmem:[%s1335_s1 + $0x80] sm:$0xff]   ;;  %858 = vmatpush3.bf16.msra.mxu0 %v949_v2  ;;  %v954_v7 = vld [vmem:[%s1335_s1 + $0x88] sm:$0xff]   ;;  %v958_v11 = vld [vmem:[%s1335_s1 + $0x90] sm:$0xff]  }
   0x5   :  { %880 = vmatpush3.bf16.msra.mxu1 %v950_v3  ;;  %859 = vmatprep.subr.bf16.mxu0 %v951_v4  ;;  %v959_v12 = vld [vmem:[%s1335_s1 + $0x58] sm:$0xff]   ;;  %v963_v16 = vld [vmem:[%s1335_s1 + $0x60] sm:$0xff]   ;;  %v967_v20 = vld [vmem:[%s1335_s1 + $0x68] sm:$0xff]  }
   0x6   :  { %881 = vmatprep.subr.bf16.mxu1 %v952_v5  ;;  %v960_v13 = vld [vmem:[%s1335_s1 + $0xd8] sm:$0xff]   ;;  %v964_v17 = vld [vmem:[%s1335_s1 + $0xe0] sm:$0xff]   ;;  %v968_v21 = vld [vmem:[%s1335_s1 + $0xe8] sm:$0xff]  }
   0x7   :  { %v961_v14 = vld [vmem:[%s1335_s1 + $0x18] sm:$0xff]   ;;  %v965_v18 = vld [vmem:[%s1335_s1 + $0x20] sm:$0xff]   ;;  %v969_v22 = vld [vmem:[%s1335_s1 + $0x28] sm:$0xff]  }
   0x8   :  { %860 = vmatpush3.bf16.msra.mxu0 %v953_v6  ;;  %v962_v15 = vld [vmem:[%s1335_s1 + $0x98] sm:$0xff]   ;;  %v966_v19 = vld [vmem:[%s1335_s1 + $0xa0] sm:$0xff]   ;;  %v970_v23 = vld [vmem:[%s1335_s1 + $0xa8] sm:$0xff]  }
   0x9   :  { %882 = vmatpush3.bf16.msra.mxu1 %v954_v7  ;;  %861 = vmatprep.subr.bf16.mxu0 %v955_v8  ;;  %v971_v24 = vld [vmem:[%s1335_s1 + $0x70] sm:$0xff]   ;;  %v975_v28 = vld [vmem:[%s1335_s1 + $0x78] sm:$0xff]   ;;  %v33_v32 = vld [vmem:[%s1334_s0] sm:$0xff] }
   0xa   :  { %883 = vmatprep.subr.bf16.mxu1 %v956_v9  ;;  %v972_v25 = vld [vmem:[%s1335_s1 + $0xf0] sm:$0xff]   ;;  %v976_v29 = vld [vmem:[%s1335_s1 + $0xf8] sm:$0xff]   ;;  %v34_v33 = vld [vmem:[%s1334_s0 + $0x8] sm:$0xff]  ;;  %v785_v34 = vcombine.low %v33_v32, %v33_v32  ;;  %v786_v35 = vcombine.high %v33_v32, %v33_v32 }
   0xb   :  { %v973_v26 = vld [vmem:[%s1335_s1 + $0x30] sm:$0xff]   ;;  %v977_v30 = vld [vmem:[%s1335_s1 + $0x38] sm:$0xff]   ;;  %v787_v36 = vcombine.low %v34_v33, %v34_v33  ;;  %v788_v37 = vcombine.high %v34_v33, %v34_v33  ;;  %v983_v38 = vld [vmem:[%s1335_s1 + $0x140] sm:$0xff]  }
   0xc   :  { %862 = vmatpush3.bf16.msra.mxu0 %v957_v10  ;;  %v974_v27 = vld [vmem:[%s1335_s1 + $0xb0] sm:$0xff]   ;;  %v978_v31 = vld [vmem:[%s1335_s1 + $0xb8] sm:$0xff]   ;;  %v984_v39 = vld [vmem:[%s1335_s1 + $0x1c0] sm:$0xff]   ;;  %609 = vmatprep.mubr.bf16.mxu0 %v786_v35 }
   0xd   :  { %884 = vmatpush3.bf16.msra.mxu1 %v958_v11  ;;  %863 = vmatprep.subr.bf16.mxu0 %v959_v12  ;;  %v985_v40 = vld [vmem:[%s1335_s1 + $0x100] sm:$0xff]   ;;  %v987_v42 = vld [vmem:[%s1335_s1 + $0x148] sm:$0xff]   ;;  %v991_v46 = vld [vmem:[%s1335_s1 + $0x150] sm:$0xff]  }
   0xe   :  { %885 = vmatprep.subr.bf16.mxu1 %v960_v13  ;;  %649 = vmatprep.mubr.bf16.mxu1 %v788_v37  ;;  %v986_v41 = vld [vmem:[%s1335_s1 + $0x180] sm:$0xff]   ;;  %v988_v43 = vld [vmem:[%s1335_s1 + $0x1c8] sm:$0xff]   ;;  %v992_v47 = vld [vmem:[%s1335_s1 + $0x1d0] sm:$0xff]  }
   0xf   :  { %v989_v44 = vld [vmem:[%s1335_s1 + $0x108] sm:$0xff]   ;;  %v993_v48 = vld [vmem:[%s1335_s1 + $0x110] sm:$0xff]   ;;  %v995_v50 = vld [vmem:[%s1335_s1 + $0x158] sm:$0xff]  }
  0x10   :  { %864 = vmatpush3.bf16.msra.mxu0 %v961_v14  ;;  %v990_v45 = vld [vmem:[%s1335_s1 + $0x188] sm:$0xff]   ;;  %v994_v49 = vld [vmem:[%s1335_s1 + $0x190] sm:$0xff]   ;;  %v996_v51 = vld [vmem:[%s1335_s1 + $0x1d8] sm:$0xff]  }
  0x11   :  { %886 = vmatpush3.bf16.msra.mxu1 %v962_v15  ;;  %865 = vmatprep.subr.bf16.mxu0 %v963_v16  ;;  %v997_v52 = vld [vmem:[%s1335_s1 + $0x118] sm:$0xff]   ;;  %v999_v54 = vld [vmem:[%s1335_s1 + $0x160] sm:$0xff]   ;;  %v1003_v58 = vld [vmem:[%s1335_s1 + $0x168] sm:$0xff]  }
  0x12   :  { %887 = vmatprep.subr.bf16.mxu1 %v964_v17  ;;  %v998_v53 = vld [vmem:[%s1335_s1 + $0x198] sm:$0xff]   ;;  %v1000_v55 = vld [vmem:[%s1335_s1 + $0x1e0] sm:$0xff]   ;;  %v1004_v59 = vld [vmem:[%s1335_s1 + $0x1e8] sm:$0xff]  }
  0x13   :  { %v1001_v56 = vld [vmem:[%s1335_s1 + $0x120] sm:$0xff]   ;;  %v1005_v60 = vld [vmem:[%s1335_s1 + $0x128] sm:$0xff]   ;;  %v1007_v62 = vld [vmem:[%s1335_s1 + $0x170] sm:$0xff]  }
  0x14   :  { %866 = vmatpush3.bf16.msra.mxu0 %v965_v18  ;;  %v1002_v57 = vld [vmem:[%s1335_s1 + $0x1a0] sm:$0xff]   ;;  %v1006_v61 = vld [vmem:[%s1335_s1 + $0x1a8] sm:$0xff]   ;;  %v1008_v63 = vld [vmem:[%s1335_s1 + $0x1f0] sm:$0xff]  }
  0x15   :  { %888 = vmatpush3.bf16.msra.mxu1 %v966_v19  ;;  %867 = vmatprep.subr.bf16.mxu0 %v967_v20  ;;  %v1009_v0 = vld [vmem:[%s1335_s1 + $0x130] sm:$0xff]   ;;  %v1011_v2 = vld [vmem:[%s1335_s1 + $0x178] sm:$0xff]  }
  0x16   :  { %889 = vmatprep.subr.bf16.mxu1 %v968_v21  ;;  %v1010_v1 = vld [vmem:[%s1335_s1 + $0x1b0] sm:$0xff]   ;;  %v1012_v3 = vld [vmem:[%s1335_s1 + $0x1f8] sm:$0xff]  }
  0x17   :  { %v1013_v4 = vld [vmem:[%s1335_s1 + $0x138] sm:$0xff]   ;;  %v35_v6 = vld [vmem:[%s1334_s0 + $0x10] sm:$0xff] }
  0x18   :  { %868 = vmatpush3.bf16.msra.mxu0 %v969_v22  ;;  %v1014_v5 = vld [vmem:[%s1335_s1 + $0x1b8] sm:$0xff]   ;;  %v789_v7 = vcombine.low %v35_v6, %v35_v6  ;;  %v790_v8 = vcombine.high %v35_v6, %v35_v6 }
  0x19   :  { %890 = vmatpush3.bf16.msra.mxu1 %v970_v23  ;;  %869 = vmatprep.subr.bf16.mxu0 %v971_v24  ;;  %v36_v9 = vld [vmem:[%s1334_s0 + $0x18] sm:$0xff] }
  0x1a   :  { %891 = vmatprep.subr.bf16.mxu1 %v972_v25 }
  0x1c   :  { %870 = vmatpush3.bf16.msra.mxu0 %v973_v26 }
  0x1d   :  { %892 = vmatpush3.bf16.msra.mxu1 %v974_v27  ;;  %871 = vmatprep.subr.bf16.mxu0 %v975_v28 }
  0x1e   :  { %893 = vmatprep.subr.bf16.mxu1 %v976_v29 }
  0x20   :  { %872 = vmatpush3.bf16.msra.mxu0 %v977_v30 }
  0x21   :  { %894 = vmatpush3.bf16.msra.mxu1 %v978_v31  ;;  %901 = vmatprep.subr.bf16.mxu0 %v983_v38 }
  0x22   :  { %923 = vmatprep.subr.bf16.mxu1 %v984_v39 }
  0x23   :  { %610 = vmatmul.mubr.bf16.vlgmr.msra.gmra.mrb[0].mxu0 %v785_v34 }
  0x24   :  { %650 = vmatmul.mubr.bf16.vlgmr.msra.gmra.mrb[0].mxu1 %v787_v36  ;;  %902 = vmatpush3.bf16.msra.mxu0 %v985_v40 }
  0x25   :  { %924 = vmatpush3.bf16.msra.mxu1 %v986_v41  ;;  %903 = vmatprep.subr.bf16.mxu0 %v987_v42 }
  0x26   :  { %925 = vmatprep.subr.bf16.mxu1 %v988_v43 }
  0x28   :  { %904 = vmatpush3.bf16.msra.mxu0 %v989_v44 }
  0x29   :  { %926 = vmatpush3.bf16.msra.mxu1 %v990_v45  ;;  %905 = vmatprep.subr.bf16.mxu0 %v991_v46 }
  0x2a   :  { %927 = vmatprep.subr.bf16.mxu1 %v992_v47 }
  0x2c   :  { %906 = vmatpush3.bf16.msra.mxu0 %v993_v48 }
  0x2d   :  { %928 = vmatpush3.bf16.msra.mxu1 %v994_v49  ;;  %907 = vmatprep.subr.bf16.mxu0 %v995_v50 }
  0x2e   :  { %929 = vmatprep.subr.bf16.mxu1 %v996_v51 }
  0x30   :  { %908 = vmatpush3.bf16.msra.mxu0 %v997_v52 }
  0x31   :  { %930 = vmatpush3.bf16.msra.mxu1 %v998_v53  ;;  %909 = vmatprep.subr.bf16.mxu0 %v999_v54 }
  0x32   :  { %931 = vmatprep.subr.bf16.mxu1 %v1000_v55 }
  0x34   :  { %910 = vmatpush3.bf16.msra.mxu0 %v1001_v56 }
  0x35   :  { %932 = vmatpush3.bf16.msra.mxu1 %v1002_v57  ;;  %911 = vmatprep.subr.bf16.mxu0 %v1003_v58 }
  0x36   :  { %933 = vmatprep.subr.bf16.mxu1 %v1004_v59 }
  0x38   :  { %912 = vmatpush3.bf16.msra.mxu0 %v1005_v60 }
  0x39   :  { %934 = vmatpush3.bf16.msra.mxu1 %v1006_v61  ;;  %913 = vmatprep.subr.bf16.mxu0 %v1007_v62 }
  0x3a   :  { %935 = vmatprep.subr.bf16.mxu1 %v1008_v63 }
  0x3c   :  { %914 = vmatpush3.bf16.msra.mxu0 %v1009_v0 }
  0x3d   :  { %936 = vmatpush3.bf16.msra.mxu1 %v1010_v1  ;;  %915 = vmatprep.subr.bf16.mxu0 %v1011_v2 }
  0x3e   :  { %937 = vmatprep.subr.bf16.mxu1 %v1012_v3 }
  0x3f   :  { %11 = vsyncpa [#allocation5], 0  ;;  %v791_v10 = vcombine.low %v36_v9, %v36_v9  ;;  %v792_v11 = vcombine.high %v36_v9, %v36_v9  ;;  %689 = vmatprep.mubr.bf16.mxu0 %v790_v8  ;;  %v784_v12 = vld [vmem:[%s1336_s2] ss:$0 sm:$0xff]  ;;  %vm30_vm0 = vcmask 80896   ;;  %s1071_s0 = smov [#allocation2]  }
  0x40   :  { %916 = vmatpush3.bf16.msra.mxu0 %v1013_v4  ;;  %31 = vst.msk [vmem:[#allocation2] sm:$0xff] %vm30_vm0, %v784_v12  ;;  %s762_s2 = sshll.u32 %s1071_s0, 4  ;;  %s763_s2 = int_to_ptr.vmem [resolvable:$true] %s762_s2 }
  0x41   :  { %938 = vmatpush3.bf16.msra.mxu1 %v1014_v5  ;;  %729 = vmatprep.mubr.bf16.mxu1 %v792_v11  ;;  %s1023_s22 = scalar_lea.vmem %s763_s2, 128  ;;  %p1028_p1 = scmp.lt.s32.totalorder %s763_s2, %s763_s2 }
  0x42   :  { %p1024_p0 = scmp.ne.s32.totalorder %s763_s2, %s1023_s22  ;;  %p1029_p2 = scmp.lt.s32.totalorder %s1023_s22, %s1023_s22 }
  0x43   :  { %690 = vmatmul.mubr.bf16.vlgmr.msra.gmra.mrb[4].mxu0 %v789_v7 }
  0x44   :  { %730 = vmatmul.mubr.bf16.vlgmr.msra.gmra.mrb[4].mxu1 %v791_v10  ;;  %p1030_p3 = por %p1029_p2, %p1028_p1 }
  0x46   :  { %p1031_p4 = pnand %p1030_p3, %p1024_p0 }
  0x47   :  { %v32_v35 = vld [vmem:[#allocation2] sm:$0xff] }
  0xf6   :  { %v873_v13 = vpop.f32.mrb[0].mxu0 }
  0xf7   :  { %v895_v14 = vpop.f32.mrb[0].mxu1  ;;  %v874_v15 = vpop.f32.mrb[1].mxu0 }
  0xf8   :  { %v896_v16 = vpop.f32.mrb[1].mxu1  ;;  %v875_v17 = vadd.f32 %v874_v15, %v873_v13  ;;  %v876_v19 = vpop.f32.mrb[2].mxu0 }
  0xf9   :  { %v897_v18 = vadd.f32 %v896_v16, %v895_v14  ;;  %v898_v20 = vpop.f32.mrb[2].mxu1  ;;  %v877_v21 = vpop.f32.mrb[3].mxu0 }
  0xfa   :  { %v899_v22 = vpop.f32.mrb[3].mxu1 }
  0xfb   :  { %v652_v23 = vadd.f32 %v897_v18, %v875_v17 }
 0x116   :  { %v917_v24 = vpop.f32.mrb[4].mxu0 }
 0x117   :  { %v939_v25 = vpop.f32.mrb[4].mxu1  ;;  %v918_v26 = vpop.f32.mrb[5].mxu0 }
 0x118   :  { %v940_v27 = vpop.f32.mrb[5].mxu1  ;;  %v919_v28 = vadd.f32 %v918_v26, %v917_v24  ;;  %v920_v30 = vpop.f32.mrb[6].mxu0 }
 0x119   :  { %v941_v29 = vadd.f32 %v940_v27, %v939_v25  ;;  %v942_v31 = vpop.f32.mrb[6].mxu1  ;;  %v921_v32 = vpop.f32.mrb[7].mxu0 }
 0x11a   :  { %v943_v33 = vpop.f32.mrb[7].mxu1  ;;  %v692_v34 = vadd.f32 %v919_v28, %v652_v23 }
 0x11c   :  { %v732_v36 = vadd.f32 %v941_v29, %v692_v34 }
 0x11e   :  { %v737_v37 = vadd.f32 %v732_v36, %v32_v35 }
 0x120   :  { %739 = vst.msk [vmem:[#allocation2] sm:$0xff] %vm30_vm0, %v737_v37 }
 0x127   :  { %v743_v38 = vld [vmem:[#allocation2] sm:$0xff] }
 0x128   :  { %v744_v39 = vsel %vm30_vm0, %v743_v38, -inf }
 0x129   :  { %745 = vmax.xlane.f32.xlu0 %v744_v39 }
 0x1b6   :  { %v746_v40 = vpop.xlane.xlu0 %745 }
 0x1b7   :  { %v747_v41 = vsub.f32 %v743_v38, %v746_v40 }
 0x1b9   :  { %v748_v42 = vmul.f32 1.442695, %v747_v41 }
 0x1bb   :  { %1019 = vpow2.f32 %v748_v42 }
 0x1c5   :  { %v1020_v43 = vpop.eup %1019 }
 0x1c6   :  { %v750_v44 = vsel %vm30_vm0, %v1020_v43, 0.0 }
 0x1c7   :  { %751 = vadd.xlane.f32.xlu0 %v750_v44 }
 0x1c8   :  { %1034 = shalt.err (!%p1031_p4)
}
 0x1c9   :  { %s1035_s25 = scalar_lea.hbm %s1337_s3, 128 }
 0x1ca   :  { %p1036_p5 = scmp.ne.s32.totalorder %s1337_s3, %s1035_s25  ;;  %p1039_p6 = scmp.lt.u32.totalorder %s1035_s25, %s1337_s3 }
 0x1cc   :  { %p1041_p7 = pnand %p1039_p6, %p1036_p5 }
 0x1ce   :  { %1044 = shalt.err (!%p1041_p7)
}
 0x1cf   :  { %765 = dma.vmem_to_hbm [thread:$0]  %s763_s2, 128, %s1337_s3, [#allocation3]  }
 0x1d0   :  { %s1072_s6 = smov [#allocation4]  }
 0x1d1   :  { %s772_s7 = sshll.u32 %s1072_s6, 4  ;;  %s773_s7 = int_to_ptr.vmem [resolvable:$true] %s772_s7 }
 0x1d2   :  { %s1045_s8 = scalar_lea.vmem %s773_s7, 128  ;;  %p1050_p9 = scmp.lt.s32.totalorder %s773_s7, %s773_s7 }
 0x1d3   :  { %p1046_p8 = scmp.ne.s32.totalorder %s773_s7, %s1045_s8  ;;  %p1051_p10 = scmp.lt.s32.totalorder %s1045_s8, %s1045_s8 }
 0x1d5   :  { %p1052_p11 = por %p1051_p10, %p1050_p9 }
 0x1d7   :  { %p1053_p12 = pnand %p1052_p11, %p1046_p8 }
 0x254   :  { %v752_v45 = vpop.xlane.xlu0 %751 }
 0x255   :  { %1021 = vrcp.f32 %v752_v45 }
 0x25f   :  { %v1022_v46 = vpop.eup %1021 }
 0x260   :  { %v754_v47 = vmul.f32 %v1022_v46, %v1020_v43 }
 0x262   :  { %755 = vst.msk [vmem:[#allocation4] sm:$0xff] %vm30_vm0, %v754_v47 }
 0x263   :  { %1056 = shalt.err (!%p1053_p12)
}
 0x264   :  { %s1057_s3 = scalar_lea.hbm %s1338_s4, 128 }
 0x265   :  { %p1058_p13 = scmp.ne.s32.totalorder %s1338_s4, %s1057_s3  ;;  %p1061_p0 = scmp.lt.u32.totalorder %s1057_s3, %s1338_s4 }
 0x267   :  { %p1063_p1 = pnand %p1061_p0, %p1058_p13 }
 0x269   :  { %1066 = shalt.err (!%p1063_p1)
}
 0x26a   :  { %775 = dma.vmem_to_hbm [thread:$0]  %s773_s7, 128, %s1338_s4, [#allocation5]  }
 0x26b   :  { %1067 = dma.done.wait [#allocation3], 128  }
 0x26c   :  { %1068 = vsyncadd [#allocation3], 4294967168 }
 0x26d   :  { %1069 = dma.done.wait [#allocation5], 128  }
 0x26e   :  { %1070 = vsyncadd [#allocation5], 4294967168 }
 0x26f   :  { %782 = vsyncpa [#allocation3], 1 }
 0x270   :  { %783 = vsyncpa [#allocation5], 1 }

</bundles_post_ra>
